<compile_context>
chip_gen: v7x
topology: tpu7x:2x2x1
jax: 0.10.0
libtpu: 0.0.40
codegen_flags: <defaults>
</compile_context>

<pallas_src>
import functools

import numpy as np
import jax
import jax.numpy as jnp
from jax import lax
from jax.experimental import pallas as pl
from jax.experimental.pallas import tpu as pltpu


_EPS = 1e-5        # nn.InstanceNorm2d default eps
_NEG_SLOPE = 0.01  # nn.LeakyReLU default negative_slope


def _round_up(x, m):
    return (x + m - 1) // m * m


def _norm_act(y, mask, inv_count, norm):
    """Fused InstanceNorm(affine=False)+ReLU (norm=True) or LeakyReLU (norm=False).

    y:    (OCp, S_w) f32 conv output (garbage on border ring / lane tail).
    mask: (1, S_w) f32, 1.0 on the Hh*Wh interior pixels, 0.0 elsewhere.
    Returns a masked activation (zero outside the interior) so it is exactly the
    zero padding the next 3x3 conv needs.
    """
    if norm:
        ym = y * mask
        s1 = jnp.sum(ym, axis=1, keepdims=True)           # sum(y * mask)
        s2 = jnp.sum(ym * y, axis=1, keepdims=True)        # sum(y^2 * mask)
        mean = s1 * inv_count
        var = jnp.maximum(s2 * inv_count - mean * mean, 0.0)   # biased, like torch
        return jnp.maximum((y - mean) * lax.rsqrt(var + _EPS), 0.0) * mask
    return jnp.where(y > 0, y, _NEG_SLOPE * y) * mask


def _shift_store(dst_ref, row0, nrows, src, off, width):
    """dst[row0:row0+nrows, p] = src[:, p + off], zero where p + off is out of range.

    All offsets/lengths are static Python ints -> plain (possibly masked) lane
    slices, no guard band needed.
    """
    dtype = dst_ref.dtype
    rows = slice(row0, row0 + nrows)
    if off == 0:
        dst_ref[rows, :] = src.astype(dtype)
    elif off > 0:
        dst_ref[rows, 0:width - off] = src[:, off:width].astype(dtype)
        dst_ref[rows, width - off:width] = jnp.zeros((nrows, off), dtype)
    else:
        a = -off
        dst_ref[rows, a:width] = src[:, 0:width - a].astype(dtype)
        dst_ref[rows, 0:a] = jnp.zeros((nrows, a), dtype)


def _down_kernel(x_ref, m_ref, w1_ref, w2_ref, o_ref, slab1_ref, slab2_ref, *,
                 offsets, width, cp, ocp, inv_count, norm):
    """Per-sample fused body.

    x_ref:     (1, Cp, S_w)    flattened zero-ring-padded pooled input
    m_ref:     (1, S_w)        interior mask (f32)
    w1_ref:    (OCp, 9*Cp)     conv1 weights, taps stacked along K
    w2_ref:    (OCp, 9*OCp)    conv2 weights, taps stacked along K
    o_ref:     (1, OCp, S_w)
    slab1_ref: (9*Cp, S_w)     VMEM scratch: conv1 tap slab (compute dtype)
    slab2_ref: (9*OCp, S_w)    VMEM scratch: conv2 tap slab (f32 keeps h1 precision)
    """
    f32 = jnp.float32
    x = x_ref[0]                      # (Cp, S_w)
    mask = m_ref[...]                 # (1, S_w) f32

    # ---- conv1: build tap slab, single K=9*Cp matmul, f32 accumulation ----
    for k, off in enumerate(offsets):
        _shift_store(slab1_ref, k * cp, cp, x, off, width)
    y1 = jnp.dot(w1_ref[...], slab1_ref[...], preferred_element_type=f32)
    h1 = _norm_act(y1, mask, inv_count, norm)          # (OCp, S_w) f32, masked

    # ---- conv2: f32 slab/matmul (intermediate activation never re-quantized) ----
    for k, off in enumerate(offsets):
        _shift_store(slab2_ref, k * ocp, ocp, h1, off, width)
    y2 = jnp.dot(w2_ref[...].astype(f32), slab2_ref[...],
                 preferred_element_type=f32)
    out = _norm_act(y2, mask, inv_count, norm)
    o_ref[0] = out.astype(o_ref.dtype)                 # lane-dense store


@functools.partial(jax.jit, static_argnames=("norm", "compute_dtype"))
def down_forward(x, w1, w2, *, norm=True, compute_dtype=jnp.float32):
    """Forward of `down`: MaxPool2d(2) -> (Conv3x3 no-bias -> IN -> ReLU) x 2.

    x: (N, C, H, W) NCHW, w1: (OC, C, 3, 3), w2: (OC, OC, 3, 3).
    norm=False reproduces the (Conv -> LeakyReLU) x 2 branch of double_conv.
    Returns (N, OC, H//2, W//2) float32.
    """
    N, C, H, W = x.shape
    OC = w1.shape[0]
    assert H % 2 == 0 and W % 2 == 0, "MaxPool2d(2) expects even spatial dims"
    Hh, Wh = H // 2, W // 2
    HP, WP = Hh + 2, Wh + 2
    S = HP * WP
    S_w = _round_up(S, 128)            # lane width, 128-aligned
    Cp = _round_up(C, 8)               # sublane-aligned channel counts
    OCp = _round_up(OC, 8)

    # --- MaxPool2d(2): cheap, 4x-shrinking prep kept in XLA ---
    pooled = jnp.maximum(
        jnp.maximum(x[:, :, 0::2, 0::2], x[:, :, 0::2, 1::2]),
        jnp.maximum(x[:, :, 1::2, 0::2], x[:, :, 1::2, 1::2]))

    # Zero ring (= conv1 padding) + channel pad, flatten, lane pad.  No guard band.
    padded = jnp.pad(pooled, ((0, 0), (0, Cp - C), (1, 1), (1, 1)))
    x_ext = jnp.pad(padded.reshape(N, Cp, S), ((0, 0), (0, 0), (0, S_w - S)))
    x_ext = x_ext.astype(compute_dtype)

    # Interior mask: 1.0 on the Hh x Wh valid output pixels of the padded frame.
    m2d = np.zeros((HP, WP), np.float32)
    m2d[1:1 + Hh, 1:1 + Wh] = 1.0
    mvec = np.zeros((1, S_w), np.float32)
    mvec[0, :S] = m2d.reshape(-1)
    mask = jnp.asarray(mvec)

    # Tap-stacked weights: w_flat[o, k*Cp + c] = w[o, c, dy, dx], k = dy*3 + dx.
    w1_t = jnp.pad(jnp.transpose(w1, (0, 2, 3, 1)),
                   ((0, OCp - OC), (0, 0), (0, 0), (0, Cp - C)))
    w1_flat = w1_t.reshape(OCp, 9 * Cp).astype(compute_dtype)
    w2_t = jnp.pad(jnp.transpose(w2, (0, 2, 3, 1)),
                   ((0, OCp - OC), (0, 0), (0, 0), (0, OCp - OC)))
    w2_flat = w2_t.reshape(OCp, 9 * OCp).astype(compute_dtype)

    # Tap k = dy*3+dx  <->  flattened offset (dy-1)*WP + (dx-1).
    offsets = tuple((dy - 1) * WP + (dx - 1) for dy in range(3) for dx in range(3))

    # --- VMEM budget (<= 64 MiB so the same plan fits v7x) + cost estimate ---
    isz = jnp.dtype(compute_dtype).itemsize
    vmem_need = (2 * Cp * S_w * isz              # x blocks (double-buffered)
                 + 2 * OCp * S_w * 4             # out blocks
                 + 2 * S_w * 4                   # mask
                 + 2 * OCp * 9 * Cp * isz + 2 * OCp * 9 * OCp * isz
                 + 9 * Cp * S_w * isz            # slab1
                 + 9 * OCp * S_w * 4             # slab2
                 + 6 * OCp * S_w * 4)            # headroom for y1/h1/y2 values
    vmem_limit = int(min(max(2 * vmem_need, 32 * 1024 * 1024), 64 * 1024 * 1024))

    cost = pl.CostEstimate(
        flops=int(2 * N * S_w * (9 * Cp * OCp + 9 * OCp * OCp)
                  + 12 * N * OCp * S_w),
        transcendentals=int(2 * N * OCp),
        bytes_accessed=int(x_ext.size * isz + N * OCp * S_w * 4
                           + w1_flat.size * isz + w2_flat.size * isz
                           + mask.size * 4))

    kernel = functools.partial(
        _down_kernel, offsets=offsets, width=S_w, cp=Cp, ocp=OCp,
        inv_count=1.0 / float(Hh * Wh), norm=norm)

    out_flat = pl.pallas_call(
        kernel,
        out_shape=jax.ShapeDtypeStruct((N, OCp, S_w), jnp.float32),
        grid_spec=pltpu.PrefetchScalarGridSpec(
            num_scalar_prefetch=0,
            grid=(N,),
            in_specs=[
                pl.BlockSpec((1, Cp, S_w), lambda n: (n, 0, 0)),
                pl.BlockSpec((1, S_w), lambda n: (0, 0)),
                pl.BlockSpec((OCp, 9 * Cp), lambda n: (0, 0)),
                pl.BlockSpec((OCp, 9 * OCp), lambda n: (0, 0)),
            ],
            out_specs=pl.BlockSpec((1, OCp, S_w), lambda n: (n, 0, 0)),
            scratch_shapes=[
                pltpu.VMEM((9 * Cp, S_w), compute_dtype),   # conv1 tap slab
                pltpu.VMEM((9 * OCp, S_w), jnp.float32),    # conv2 tap slab (f32)
            ],
        ),
        compiler_params=pltpu.CompilerParams(
            dimension_semantics=("parallel",),   # batch sharded across TCs (v7x)
            vmem_limit_bytes=vmem_limit,
        ),
        cost_estimate=cost,
    )(x_ext, mask, w1_flat, w2_flat)

    # Un-pad: drop padded channels/lane tail, keep the Hh x Wh interior.
    # TODO(synk): emitting a compact (OC, Hh*Wh) output from the kernel would
    # remove this extra XLA read+write of the output.
    out = out_flat[:, :OC, :S].reshape(N, OC, HP, WP)[:, :, 1:1 + Hh, 1:1 + Wh]
    return out


def _down_ref(x, w1, w2, *, norm=True):
    """Pure-XLA reference matching the PyTorch module."""
    pooled = lax.reduce_window(x, -jnp.inf, lax.max,
                               (1, 1, 2, 2), (1, 1, 2, 2), "VALID")

    def block(h, w):
        y = lax.conv_general_dilated(
            h, w, (1, 1), [(1, 1), (1, 1)],
            dimension_numbers=("NCHW", "OIHW", "NCHW"))
        if norm:
            mu = jnp.mean(y, axis=(2, 3), keepdims=True)
            var = jnp.var(y, axis=(2, 3), keepdims=True)   # biased, like torch IN
            return jnp.maximum((y - mu) * lax.rsqrt(var + _EPS), 0.0)
        return jnp.where(y > 0, y, _NEG_SLOPE * y)

    return block(block(pooled, w1), w2)


if __name__ == "__main__":
    # down(in_ch=4, out_ch=8), x: (2, 4, 16, 16)
    N, C, H, W = 2, 4, 16, 16
    OC = 8

    key = jax.random.PRNGKey(0)
    kx, k1, k2 = jax.random.split(key, 3)
    x = jax.random.normal(kx, (N, C, H, W), dtype=jnp.float32)
    b1 = 1.0 / np.sqrt(C * 9)
    b2 = 1.0 / np.sqrt(OC * 9)
    w1 = jax.random.uniform(k1, (OC, C, 3, 3), jnp.float32, -b1, b1)
    w2 = jax.random.uniform(k2, (OC, OC, 3, 3), jnp.float32, -b2, b2)

    # Default `down` config: norm=True (Conv -> InstanceNorm -> ReLU) x 2, f32.
    out = jax.block_until_ready(down_forward(x, w1, w2, norm=True))
    ref = _down_ref(x, w1, w2, norm=True)
    np.testing.assert_allclose(np.asarray(out), np.asarray(ref), rtol=2e-4, atol=2e-4)

    # norm=False branch (Conv -> LeakyReLU) x 2.
    out_nf = jax.block_until_ready(down_forward(x, w1, w2, norm=False))
    ref_nf = _down_ref(x, w1, w2, norm=False)
    np.testing.assert_allclose(np.asarray(out_nf), np.asarray(ref_nf), rtol=2e-4, atol=2e-4)

    # bf16 inputs/weights (f32 MXU accumulation, f32 intermediate + epilogue).
    out_bf = jax.block_until_ready(
        down_forward(x, w1, w2, norm=True, compute_dtype=jnp.bfloat16))
    np.testing.assert_allclose(np.asarray(out_bf), np.asarray(ref), rtol=5e-2, atol=5e-2)

    print("KERNEL_OK")
</pallas_src>

<mosaic_0001>
module attributes {stable_mosaic.version = 11 : i64} {
  func.func @_down_kernel(%arg0: i32, %arg1: memref<1x8x128xf32, #tpu.memory_space<vmem>>, %arg2: memref<1x128xf32, #tpu.memory_space<vmem>>, %arg3: memref<8x72xf32, #tpu.memory_space<vmem>>, %arg4: memref<8x72xf32, #tpu.memory_space<vmem>>, %arg5: memref<1x8x128xf32, #tpu.memory_space<vmem>>, %arg6: memref<72x128xf32, #tpu.memory_space<vmem>>, %arg7: memref<72x128xf32, #tpu.memory_space<vmem>>) attributes {dimension_semantics = [#tpu.dimension_semantics<parallel>], iteration_bounds = array<i64: 2>, scalar_prefetch = 0 : i64, scratch_operands = 2 : i64, tpu.core_type = #tpu.core_type<tc>, window_params = [{transform_indices = @transform_0, window_bounds = array<i64: 1, 8, 128>}, {pipeline_mode = #tpu.pipeline_mode<synchronous>, transform_indices = @transform_1, window_bounds = array<i64: 1, 128>}, {pipeline_mode = #tpu.pipeline_mode<synchronous>, transform_indices = @transform_2, window_bounds = array<i64: 8, 72>}, {pipeline_mode = #tpu.pipeline_mode<synchronous>, transform_indices = @transform_3, window_bounds = array<i64: 8, 72>}, {transform_indices = @transform_4, window_bounds = array<i64: 1, 8, 128>}]} {
    %c0 = arith.constant 0 : index
    %c0_0 = arith.constant 0 : index
    %c0_1 = arith.constant 0 : index
    %0 = vector.load %arg1[%c0, %c0_0, %c0_1] : memref<1x8x128xf32, #tpu.memory_space<vmem>>, vector<1x8x128xf32>
    %1 = vector.shape_cast %0 : vector<1x8x128xf32> to vector<8x128xf32>
    %c0_2 = arith.constant 0 : index
    %c0_3 = arith.constant 0 : index
    %2 = vector.load %arg2[%c0_2, %c0_3] : memref<1x128xf32, #tpu.memory_space<vmem>>, vector<1x128xf32>
    %3 = vector.extract_strided_slice %1 {offsets = [0, 0], sizes = [8, 117], strides = [1, 1]} : vector<8x128xf32> to vector<8x117xf32>
    %c0_4 = arith.constant 0 : index
    %c11 = arith.constant 11 : index
    %4 = vector.load %arg6[%c0_4, %c11] : memref<72x128xf32, #tpu.memory_space<vmem>>, vector<8x117xf32>
    tpu.vector_store %arg6[%c0_4, %c11], %3 {strides = array<i32>} : memref<72x128xf32, #tpu.memory_space<vmem>>, vector<8x117xf32>,
    %cst = arith.constant 0.000000e+00 : f32
    %5 = vector.broadcast %cst : f32 to vector<8x11xf32>
    %c0_5 = arith.constant 0 : index
    %c0_6 = arith.constant 0 : index
    %6 = vector.load %arg6[%c0_5, %c0_6] : memref<72x128xf32, #tpu.memory_space<vmem>>, vector<8x11xf32>
    tpu.vector_store %arg6[%c0_5, %c0_6], %5 {strides = array<i32>} : memref<72x128xf32, #tpu.memory_space<vmem>>, vector<8x11xf32>,
    %7 = vector.extract_strided_slice %1 {offsets = [0, 0], sizes = [8, 118], strides = [1, 1]} : vector<8x128xf32> to vector<8x118xf32>
    %c8 = arith.constant 8 : index
    %c10 = arith.constant 10 : index
    %8 = vector.load %arg6[%c8, %c10] : memref<72x128xf32, #tpu.memory_space<vmem>>, vector<8x118xf32>
    tpu.vector_store %arg6[%c8, %c10], %7 {strides = array<i32>} : memref<72x128xf32, #tpu.memory_space<vmem>>, vector<8x118xf32>,
    %cst_7 = arith.constant 0.000000e+00 : f32
    %9 = vector.broadcast %cst_7 : f32 to vector<8x10xf32>
    %c8_8 = arith.constant 8 : index
    %c0_9 = arith.constant 0 : index
    %10 = vector.load %arg6[%c8_8, %c0_9] : memref<72x128xf32, #tpu.memory_space<vmem>>, vector<8x10xf32>
    tpu.vector_store %arg6[%c8_8, %c0_9], %9 {strides = array<i32>} : memref<72x128xf32, #tpu.memory_space<vmem>>, vector<8x10xf32>,
    %11 = vector.extract_strided_slice %1 {offsets = [0, 0], sizes = [8, 119], strides = [1, 1]} : vector<8x128xf32> to vector<8x119xf32>
    %c16 = arith.constant 16 : index
    %c9 = arith.constant 9 : index
    %12 = vector.load %arg6[%c16, %c9] : memref<72x128xf32, #tpu.memory_space<vmem>>, vector<8x119xf32>
    tpu.vector_store %arg6[%c16, %c9], %11 {strides = array<i32>} : memref<72x128xf32, #tpu.memory_space<vmem>>, vector<8x119xf32>,
    %cst_10 = arith.constant 0.000000e+00 : f32
    %13 = vector.broadcast %cst_10 : f32 to vector<8x9xf32>
    %c16_11 = arith.constant 16 : index
    %c0_12 = arith.constant 0 : index
    %14 = vector.load %arg6[%c16_11, %c0_12] : memref<72x128xf32, #tpu.memory_space<vmem>>, vector<8x9xf32>
    tpu.vector_store %arg6[%c16_11, %c0_12], %13 {strides = array<i32>} : memref<72x128xf32, #tpu.memory_space<vmem>>, vector<8x9xf32>,
    %15 = vector.extract_strided_slice %1 {offsets = [0, 0], sizes = [8, 127], strides = [1, 1]} : vector<8x128xf32> to vector<8x127xf32>
    %c24 = arith.constant 24 : index
    %c1 = arith.constant 1 : index
    %16 = vector.load %arg6[%c24, %c1] : memref<72x128xf32, #tpu.memory_space<vmem>>, vector<8x127xf32>
    tpu.vector_store %arg6[%c24, %c1], %15 {strides = array<i32>} : memref<72x128xf32, #tpu.memory_space<vmem>>, vector<8x127xf32>,
    %cst_13 = arith.constant 0.000000e+00 : f32
    %17 = vector.broadcast %cst_13 : f32 to vector<8x1xf32>
    %c24_14 = arith.constant 24 : index
    %c0_15 = arith.constant 0 : index
    %18 = vector.load %arg6[%c24_14, %c0_15] : memref<72x128xf32, #tpu.memory_space<vmem>>, vector<8x1xf32>
    tpu.vector_store %arg6[%c24_14, %c0_15], %17 {strides = array<i32>} : memref<72x128xf32, #tpu.memory_space<vmem>>, vector<8x1xf32>,
    %c32 = arith.constant 32 : index
    %c0_16 = arith.constant 0 : index
    %19 = vector.load %arg6[%c32, %c0_16] : memref<72x128xf32, #tpu.memory_space<vmem>>, vector<8x128xf32>
    tpu.vector_store %arg6[%c32, %c0_16], %1 {strides = array<i32>} : memref<72x128xf32, #tpu.memory_space<vmem>>, vector<8x128xf32>,
    %20 = vector.extract_strided_slice %1 {offsets = [0, 1], sizes = [8, 127], strides = [1, 1]} : vector<8x128xf32> to vector<8x127xf32>
    %c40 = arith.constant 40 : index
    %c0_17 = arith.constant 0 : index
    %21 = vector.load %arg6[%c40, %c0_17] : memref<72x128xf32, #tpu.memory_space<vmem>>, vector<8x127xf32>
    tpu.vector_store %arg6[%c40, %c0_17], %20 {strides = array<i32>} : memref<72x128xf32, #tpu.memory_space<vmem>>, vector<8x127xf32>,
    %cst_18 = arith.constant 0.000000e+00 : f32
    %22 = vector.broadcast %cst_18 : f32 to vector<8x1xf32>
    %c40_19 = arith.constant 40 : index
    %c127 = arith.constant 127 : index
    %23 = vector.load %arg6[%c40_19, %c127] : memref<72x128xf32, #tpu.memory_space<vmem>>, vector<8x1xf32>
    tpu.vector_store %arg6[%c40_19, %c127], %22 {strides = array<i32>} : memref<72x128xf32, #tpu.memory_space<vmem>>, vector<8x1xf32>,
    %24 = vector.extract_strided_slice %1 {offsets = [0, 9], sizes = [8, 119], strides = [1, 1]} : vector<8x128xf32> to vector<8x119xf32>
    %c48 = arith.constant 48 : index
    %c0_20 = arith.constant 0 : index
    %25 = vector.load %arg6[%c48, %c0_20] : memref<72x128xf32, #tpu.memory_space<vmem>>, vector<8x119xf32>
    tpu.vector_store %arg6[%c48, %c0_20], %24 {strides = array<i32>} : memref<72x128xf32, #tpu.memory_space<vmem>>, vector<8x119xf32>,
    %cst_21 = arith.constant 0.000000e+00 : f32
    %26 = vector.broadcast %cst_21 : f32 to vector<8x9xf32>
    %c48_22 = arith.constant 48 : index
    %c119 = arith.constant 119 : index
    %27 = vector.load %arg6[%c48_22, %c119] : memref<72x128xf32, #tpu.memory_space<vmem>>, vector<8x9xf32>
    tpu.vector_store %arg6[%c48_22, %c119], %26 {strides = array<i32>} : memref<72x128xf32, #tpu.memory_space<vmem>>, vector<8x9xf32>,
    %28 = vector.extract_strided_slice %1 {offsets = [0, 10], sizes = [8, 118], strides = [1, 1]} : vector<8x128xf32> to vector<8x118xf32>
    %c56 = arith.constant 56 : index
    %c0_23 = arith.constant 0 : index
    %29 = vector.load %arg6[%c56, %c0_23] : memref<72x128xf32, #tpu.memory_space<vmem>>, vector<8x118xf32>
    tpu.vector_store %arg6[%c56, %c0_23], %28 {strides = array<i32>} : memref<72x128xf32, #tpu.memory_space<vmem>>, vector<8x118xf32>,
    %cst_24 = arith.constant 0.000000e+00 : f32
    %30 = vector.broadcast %cst_24 : f32 to vector<8x10xf32>
    %c56_25 = arith.constant 56 : index
    %c118 = arith.constant 118 : index
    %31 = vector.load %arg6[%c56_25, %c118] : memref<72x128xf32, #tpu.memory_space<vmem>>, vector<8x10xf32>
    tpu.vector_store %arg6[%c56_25, %c118], %30 {strides = array<i32>} : memref<72x128xf32, #tpu.memory_space<vmem>>, vector<8x10xf32>,
    %32 = vector.extract_strided_slice %1 {offsets = [0, 11], sizes = [8, 117], strides = [1, 1]} : vector<8x128xf32> to vector<8x117xf32>
    %c64 = arith.constant 64 : index
    %c0_26 = arith.constant 0 : index
    %33 = vector.load %arg6[%c64, %c0_26] : memref<72x128xf32, #tpu.memory_space<vmem>>, vector<8x117xf32>
    tpu.vector_store %arg6[%c64, %c0_26], %32 {strides = array<i32>} : memref<72x128xf32, #tpu.memory_space<vmem>>, vector<8x117xf32>,
    %cst_27 = arith.constant 0.000000e+00 : f32
    %34 = vector.broadcast %cst_27 : f32 to vector<8x11xf32>
    %c64_28 = arith.constant 64 : index
    %c117 = arith.constant 117 : index
    %35 = vector.load %arg6[%c64_28, %c117] : memref<72x128xf32, #tpu.memory_space<vmem>>, vector<8x11xf32>
    tpu.vector_store %arg6[%c64_28, %c117], %34 {strides = array<i32>} : memref<72x128xf32, #tpu.memory_space<vmem>>, vector<8x11xf32>,
    %c0_29 = arith.constant 0 : index
    %c0_30 = arith.constant 0 : index
    %36 = vector.load %arg3[%c0_29, %c0_30] : memref<8x72xf32, #tpu.memory_space<vmem>>, vector<8x72xf32>
    %c0_31 = arith.constant 0 : index
    %c0_32 = arith.constant 0 : index
    %37 = vector.load %arg6[%c0_31, %c0_32] : memref<72x128xf32, #tpu.memory_space<vmem>>, vector<72x128xf32>
    %cst_33 = arith.constant dense<0.000000e+00> : vector<8x128xf32>
    %38 = tpu.matmul %36, %37, %cst_33 {dimension_numbers = #tpu.dot_dimension_numbers<[1], [0], [0], [1], [0, 0, 1, 1], [], []>} : vector<8x72xf32>, vector<72x128xf32>, vector<8x128xf32> -> vector<8x128xf32>
    %39 = vector.broadcast %2 : vector<1x128xf32> to vector<8x128xf32>
    %40 = arith.mulf %38, %39 : vector<8x128xf32>
    %cst_34 = arith.constant dense<0.000000e+00> : vector<8xf32>
    %41 = vector.multi_reduction <add>, %40, %cst_34 [1] : vector<8x128xf32> to vector<8xf32>
    %42 = vector.shape_cast %41 : vector<8xf32> to vector<8x1xf32>
    %43 = arith.mulf %40, %38 : vector<8x128xf32>
    %cst_35 = arith.constant dense<0.000000e+00> : vector<8xf32>
    %44 = vector.multi_reduction <add>, %43, %cst_35 [1] : vector<8x128xf32> to vector<8xf32>
    %45 = vector.shape_cast %44 : vector<8xf32> to vector<8x1xf32>
    %cst_36 = arith.constant 1.562500e-02 : f32
    %46 = vector.broadcast %cst_36 : f32 to vector<8x1xf32>
    %47 = arith.mulf %42, %46 : vector<8x1xf32>
    %cst_37 = arith.constant 1.562500e-02 : f32
    %48 = vector.broadcast %cst_37 : f32 to vector<8x1xf32>
    %49 = arith.mulf %45, %48 : vector<8x1xf32>
    %50 = arith.mulf %47, %47 : vector<8x1xf32>
    %51 = arith.subf %49, %50 : vector<8x1xf32>
    %cst_38 = arith.constant 0.000000e+00 : f32
    %52 = vector.broadcast %cst_38 : f32 to vector<8x1xf32>
    %53 = arith.maximumf %51, %52 : vector<8x1xf32>
    %54 = vector.broadcast %47 : vector<8x1xf32> to vector<8x128xf32>
    %55 = arith.subf %38, %54 : vector<8x128xf32>
    %cst_39 = arith.constant 9.99999974E-6 : f32
    %56 = vector.broadcast %cst_39 : f32 to vector<8x1xf32>
    %57 = arith.addf %53, %56 : vector<8x1xf32>
    %58 = math.rsqrt %57 : vector<8x1xf32>
    %59 = vector.broadcast %58 : vector<8x1xf32> to vector<8x128xf32>
    %60 = arith.mulf %55, %59 : vector<8x128xf32>
    %cst_40 = arith.constant 0.000000e+00 : f32
    %61 = vector.broadcast %cst_40 : f32 to vector<8x128xf32>
    %62 = arith.maximumf %60, %61 : vector<8x128xf32>
    %63 = vector.broadcast %2 : vector<1x128xf32> to vector<8x128xf32>
    %64 = arith.mulf %62, %63 : vector<8x128xf32>
    %65 = vector.extract_strided_slice %64 {offsets = [0, 0], sizes = [8, 117], strides = [1, 1]} : vector<8x128xf32> to vector<8x117xf32>
    %c0_41 = arith.constant 0 : index
    %c11_42 = arith.constant 11 : index
    %66 = vector.load %arg7[%c0_41, %c11_42] : memref<72x128xf32, #tpu.memory_space<vmem>>, vector<8x117xf32>
    tpu.vector_store %arg7[%c0_41, %c11_42], %65 {strides = array<i32>} : memref<72x128xf32, #tpu.memory_space<vmem>>, vector<8x117xf32>,
    %cst_43 = arith.constant 0.000000e+00 : f32
    %67 = vector.broadcast %cst_43 : f32 to vector<8x11xf32>
    %c0_44 = arith.constant 0 : index
    %c0_45 = arith.constant 0 : index
    %68 = vector.load %arg7[%c0_44, %c0_45] : memref<72x128xf32, #tpu.memory_space<vmem>>, vector<8x11xf32>
    tpu.vector_store %arg7[%c0_44, %c0_45], %67 {strides = array<i32>} : memref<72x128xf32, #tpu.memory_space<vmem>>, vector<8x11xf32>,
    %69 = vector.extract_strided_slice %64 {offsets = [0, 0], sizes = [8, 118], strides = [1, 1]} : vector<8x128xf32> to vector<8x118xf32>
    %c8_46 = arith.constant 8 : index
    %c10_47 = arith.constant 10 : index
    %70 = vector.load %arg7[%c8_46, %c10_47] : memref<72x128xf32, #tpu.memory_space<vmem>>, vector<8x118xf32>
    tpu.vector_store %arg7[%c8_46, %c10_47], %69 {strides = array<i32>} : memref<72x128xf32, #tpu.memory_space<vmem>>, vector<8x118xf32>,
    %cst_48 = arith.constant 0.000000e+00 : f32
    %71 = vector.broadcast %cst_48 : f32 to vector<8x10xf32>
    %c8_49 = arith.constant 8 : index
    %c0_50 = arith.constant 0 : index
    %72 = vector.load %arg7[%c8_49, %c0_50] : memref<72x128xf32, #tpu.memory_space<vmem>>, vector<8x10xf32>
    tpu.vector_store %arg7[%c8_49, %c0_50], %71 {strides = array<i32>} : memref<72x128xf32, #tpu.memory_space<vmem>>, vector<8x10xf32>,
    %73 = vector.extract_strided_slice %64 {offsets = [0, 0], sizes = [8, 119], strides = [1, 1]} : vector<8x128xf32> to vector<8x119xf32>
    %c16_51 = arith.constant 16 : index
    %c9_52 = arith.constant 9 : index
    %74 = vector.load %arg7[%c16_51, %c9_52] : memref<72x128xf32, #tpu.memory_space<vmem>>, vector<8x119xf32>
    tpu.vector_store %arg7[%c16_51, %c9_52], %73 {strides = array<i32>} : memref<72x128xf32, #tpu.memory_space<vmem>>, vector<8x119xf32>,
    %cst_53 = arith.constant 0.000000e+00 : f32
    %75 = vector.broadcast %cst_53 : f32 to vector<8x9xf32>
    %c16_54 = arith.constant 16 : index
    %c0_55 = arith.constant 0 : index
    %76 = vector.load %arg7[%c16_54, %c0_55] : memref<72x128xf32, #tpu.memory_space<vmem>>, vector<8x9xf32>
    tpu.vector_store %arg7[%c16_54, %c0_55], %75 {strides = array<i32>} : memref<72x128xf32, #tpu.memory_space<vmem>>, vector<8x9xf32>,
    %77 = vector.extract_strided_slice %64 {offsets = [0, 0], sizes = [8, 127], strides = [1, 1]} : vector<8x128xf32> to vector<8x127xf32>
    %c24_56 = arith.constant 24 : index
    %c1_57 = arith.constant 1 : index
    %78 = vector.load %arg7[%c24_56, %c1_57] : memref<72x128xf32, #tpu.memory_space<vmem>>, vector<8x127xf32>
    tpu.vector_store %arg7[%c24_56, %c1_57], %77 {strides = array<i32>} : memref<72x128xf32, #tpu.memory_space<vmem>>, vector<8x127xf32>,
    %cst_58 = arith.constant 0.000000e+00 : f32
    %79 = vector.broadcast %cst_58 : f32 to vector<8x1xf32>
    %c24_59 = arith.constant 24 : index
    %c0_60 = arith.constant 0 : index
    %80 = vector.load %arg7[%c24_59, %c0_60] : memref<72x128xf32, #tpu.memory_space<vmem>>, vector<8x1xf32>
    tpu.vector_store %arg7[%c24_59, %c0_60], %79 {strides = array<i32>} : memref<72x128xf32, #tpu.memory_space<vmem>>, vector<8x1xf32>,
    %c32_61 = arith.constant 32 : index
    %c0_62 = arith.constant 0 : index
    %81 = vector.load %arg7[%c32_61, %c0_62] : memref<72x128xf32, #tpu.memory_space<vmem>>, vector<8x128xf32>
    tpu.vector_store %arg7[%c32_61, %c0_62], %64 {strides = array<i32>} : memref<72x128xf32, #tpu.memory_space<vmem>>, vector<8x128xf32>,
    %82 = vector.extract_strided_slice %64 {offsets = [0, 1], sizes = [8, 127], strides = [1, 1]} : vector<8x128xf32> to vector<8x127xf32>
    %c40_63 = arith.constant 40 : index
    %c0_64 = arith.constant 0 : index
    %83 = vector.load %arg7[%c40_63, %c0_64] : memref<72x128xf32, #tpu.memory_space<vmem>>, vector<8x127xf32>
    tpu.vector_store %arg7[%c40_63, %c0_64], %82 {strides = array<i32>} : memref<72x128xf32, #tpu.memory_space<vmem>>, vector<8x127xf32>,
    %cst_65 = arith.constant 0.000000e+00 : f32
    %84 = vector.broadcast %cst_65 : f32 to vector<8x1xf32>
    %c40_66 = arith.constant 40 : index
    %c127_67 = arith.constant 127 : index
    %85 = vector.load %arg7[%c40_66, %c127_67] : memref<72x128xf32, #tpu.memory_space<vmem>>, vector<8x1xf32>
    tpu.vector_store %arg7[%c40_66, %c127_67], %84 {strides = array<i32>} : memref<72x128xf32, #tpu.memory_space<vmem>>, vector<8x1xf32>,
    %86 = vector.extract_strided_slice %64 {offsets = [0, 9], sizes = [8, 119], strides = [1, 1]} : vector<8x128xf32> to vector<8x119xf32>
    %c48_68 = arith.constant 48 : index
    %c0_69 = arith.constant 0 : index
    %87 = vector.load %arg7[%c48_68, %c0_69] : memref<72x128xf32, #tpu.memory_space<vmem>>, vector<8x119xf32>
    tpu.vector_store %arg7[%c48_68, %c0_69], %86 {strides = array<i32>} : memref<72x128xf32, #tpu.memory_space<vmem>>, vector<8x119xf32>,
    %cst_70 = arith.constant 0.000000e+00 : f32
    %88 = vector.broadcast %cst_70 : f32 to vector<8x9xf32>
    %c48_71 = arith.constant 48 : index
    %c119_72 = arith.constant 119 : index
    %89 = vector.load %arg7[%c48_71, %c119_72] : memref<72x128xf32, #tpu.memory_space<vmem>>, vector<8x9xf32>
    tpu.vector_store %arg7[%c48_71, %c119_72], %88 {strides = array<i32>} : memref<72x128xf32, #tpu.memory_space<vmem>>, vector<8x9xf32>,
    %90 = vector.extract_strided_slice %64 {offsets = [0, 10], sizes = [8, 118], strides = [1, 1]} : vector<8x128xf32> to vector<8x118xf32>
    %c56_73 = arith.constant 56 : index
    %c0_74 = arith.constant 0 : index
    %91 = vector.load %arg7[%c56_73, %c0_74] : memref<72x128xf32, #tpu.memory_space<vmem>>, vector<8x118xf32>
    tpu.vector_store %arg7[%c56_73, %c0_74], %90 {strides = array<i32>} : memref<72x128xf32, #tpu.memory_space<vmem>>, vector<8x118xf32>,
    %cst_75 = arith.constant 0.000000e+00 : f32
    %92 = vector.broadcast %cst_75 : f32 to vector<8x10xf32>
    %c56_76 = arith.constant 56 : index
    %c118_77 = arith.constant 118 : index
    %93 = vector.load %arg7[%c56_76, %c118_77] : memref<72x128xf32, #tpu.memory_space<vmem>>, vector<8x10xf32>
    tpu.vector_store %arg7[%c56_76, %c118_77], %92 {strides = array<i32>} : memref<72x128xf32, #tpu.memory_space<vmem>>, vector<8x10xf32>,
    %94 = vector.extract_strided_slice %64 {offsets = [0, 11], sizes = [8, 117], strides = [1, 1]} : vector<8x128xf32> to vector<8x117xf32>
    %c64_78 = arith.constant 64 : index
    %c0_79 = arith.constant 0 : index
    %95 = vector.load %arg7[%c64_78, %c0_79] : memref<72x128xf32, #tpu.memory_space<vmem>>, vector<8x117xf32>
    tpu.vector_store %arg7[%c64_78, %c0_79], %94 {strides = array<i32>} : memref<72x128xf32, #tpu.memory_space<vmem>>, vector<8x117xf32>,
    %cst_80 = arith.constant 0.000000e+00 : f32
    %96 = vector.broadcast %cst_80 : f32 to vector<8x11xf32>
    %c64_81 = arith.constant 64 : index
    %c117_82 = arith.constant 117 : index
    %97 = vector.load %arg7[%c64_81, %c117_82] : memref<72x128xf32, #tpu.memory_space<vmem>>, vector<8x11xf32>
    tpu.vector_store %arg7[%c64_81, %c117_82], %96 {strides = array<i32>} : memref<72x128xf32, #tpu.memory_space<vmem>>, vector<8x11xf32>,
    %c0_83 = arith.constant 0 : index
    %c0_84 = arith.constant 0 : index
    %98 = vector.load %arg4[%c0_83, %c0_84] : memref<8x72xf32, #tpu.memory_space<vmem>>, vector<8x72xf32>
    %c0_85 = arith.constant 0 : index
    %c0_86 = arith.constant 0 : index
    %99 = vector.load %arg7[%c0_85, %c0_86] : memref<72x128xf32, #tpu.memory_space<vmem>>, vector<72x128xf32>
    %cst_87 = arith.constant dense<0.000000e+00> : vector<8x128xf32>
    %100 = tpu.matmul %98, %99, %cst_87 {dimension_numbers = #tpu.dot_dimension_numbers<[1], [0], [0], [1], [0, 0, 1, 1], [], []>} : vector<8x72xf32>, vector<72x128xf32>, vector<8x128xf32> -> vector<8x128xf32>
    %101 = vector.broadcast %2 : vector<1x128xf32> to vector<8x128xf32>
    %102 = arith.mulf %100, %101 : vector<8x128xf32>
    %cst_88 = arith.constant dense<0.000000e+00> : vector<8xf32>
    %103 = vector.multi_reduction <add>, %102, %cst_88 [1] : vector<8x128xf32> to vector<8xf32>
    %104 = vector.shape_cast %103 : vector<8xf32> to vector<8x1xf32>
    %105 = arith.mulf %102, %100 : vector<8x128xf32>
    %cst_89 = arith.constant dense<0.000000e+00> : vector<8xf32>
    %106 = vector.multi_reduction <add>, %105, %cst_89 [1] : vector<8x128xf32> to vector<8xf32>
    %107 = vector.shape_cast %106 : vector<8xf32> to vector<8x1xf32>
    %cst_90 = arith.constant 1.562500e-02 : f32
    %108 = vector.broadcast %cst_90 : f32 to vector<8x1xf32>
    %109 = arith.mulf %104, %108 : vector<8x1xf32>
    %cst_91 = arith.constant 1.562500e-02 : f32
    %110 = vector.broadcast %cst_91 : f32 to vector<8x1xf32>
    %111 = arith.mulf %107, %110 : vector<8x1xf32>
    %112 = arith.mulf %109, %109 : vector<8x1xf32>
    %113 = arith.subf %111, %112 : vector<8x1xf32>
    %cst_92 = arith.constant 0.000000e+00 : f32
    %114 = vector.broadcast %cst_92 : f32 to vector<8x1xf32>
    %115 = arith.maximumf %113, %114 : vector<8x1xf32>
    %116 = vector.broadcast %109 : vector<8x1xf32> to vector<8x128xf32>
    %117 = arith.subf %100, %116 : vector<8x128xf32>
    %cst_93 = arith.constant 9.99999974E-6 : f32
    %118 = vector.broadcast %cst_93 : f32 to vector<8x1xf32>
    %119 = arith.addf %115, %118 : vector<8x1xf32>
    %120 = math.rsqrt %119 : vector<8x1xf32>
    %121 = vector.broadcast %120 : vector<8x1xf32> to vector<8x128xf32>
    %122 = arith.mulf %117, %121 : vector<8x128xf32>
    %cst_94 = arith.constant 0.000000e+00 : f32
    %123 = vector.broadcast %cst_94 : f32 to vector<8x128xf32>
    %124 = arith.maximumf %122, %123 : vector<8x128xf32>
    %125 = vector.broadcast %2 : vector<1x128xf32> to vector<8x128xf32>
    %126 = arith.mulf %124, %125 : vector<8x128xf32>
    %c0_95 = arith.constant 0 : index
    %c0_96 = arith.constant 0 : index
    %c0_97 = arith.constant 0 : index
    %127 = vector.load %arg5[%c0_95, %c0_96, %c0_97] : memref<1x8x128xf32, #tpu.memory_space<vmem>>, vector<1x8x128xf32>
    %128 = vector.shape_cast %127 : vector<1x8x128xf32> to vector<8x128xf32>
    %129 = vector.shape_cast %126 : vector<8x128xf32> to vector<1x8x128xf32>
    tpu.vector_store %arg5[%c0_95, %c0_96, %c0_97], %129 {strides = array<i32>} : memref<1x8x128xf32, #tpu.memory_space<vmem>>, vector<1x8x128xf32>,
    return
  }
  func.func @transform_0(%arg0: i32) -> (i32, i32, i32) {
    %c0_i32 = arith.constant 0 : i32
    %c0_i32_0 = arith.constant 0 : i32
    %c0_i32_1 = arith.constant 0 : i32
    return %arg0, %c0_i32, %c0_i32_0 : i32, i32, i32
  }
  func.func @transform_1(%arg0: i32) -> (i32, i32) {
    %c0_i32 = arith.constant 0 : i32
    %c0_i32_0 = arith.constant 0 : i32
    %c0_i32_1 = arith.constant 0 : i32
    return %c0_i32, %c0_i32_0 : i32, i32
  }
  func.func @transform_2(%arg0: i32) -> (i32, i32) {
    %c0_i32 = arith.constant 0 : i32
    %c0_i32_0 = arith.constant 0 : i32
    %c0_i32_1 = arith.constant 0 : i32
    return %c0_i32, %c0_i32_0 : i32, i32
  }
  func.func @transform_3(%arg0: i32) -> (i32, i32) {
    %c0_i32 = arith.constant 0 : i32
    %c0_i32_0 = arith.constant 0 : i32
    %c0_i32_1 = arith.constant 0 : i32
    return %c0_i32, %c0_i32_0 : i32, i32
  }
  func.func @transform_4(%arg0: i32) -> (i32, i32, i32) {
    %c0_i32 = arith.constant 0 : i32
    %c0_i32_0 = arith.constant 0 : i32
    %c0_i32_1 = arith.constant 0 : i32
    return %arg0, %c0_i32, %c0_i32_0 : i32, i32, i32
  }
}

</mosaic_0001>

<bundles_post_ra>
// kernel: down_forward.1
= control target key start
LH: loop header
LB: loop body
LE: loop exit
PB: predicated region body
PF: predicated region fallthrough
CT: control target
= control target key end

     0   :  { %s721_s15 = smov 0   ;;  %s849_s0 = inlined_call_operand.vmem [shape: f32[2,8,128], index: 0, kind: input, shape index: {}]   ;;  %s850_s1 = inlined_call_operand.vmem [shape: f32[1,128], index: 1, kind: input, shape index: {}]   ;;  %s851_s2 = inlined_call_operand.vmem [shape: f32[8,72], index: 2, kind: input, shape index: {}]   ;;  %s852_s3 = inlined_call_operand.vmem [shape: f32[8,72], index: 3, kind: input, shape index: {}]   ;;  %s853_s4 = inlined_call_operand.vmem [shape: f32[2,8,128], index: 4, kind: output, shape index: {}]  }
   0x1 LB: > { %s556_s16 = sadd.s32 4294967295, %s683_s15   ;;  %p560_p0 = scmp.ge.s32.totalorder %s683_s15, 1  ;;  %s683_s15 = sphi %s721_s15, %s14_s15  }
   0x2   : > { %p161_p1 = scmp.lt.s32.totalorder %s683_s15, 3 }
   0x4   : > { %p162_p2 = pnand %p560_p0, %p161_p1 }
   0x5   : > { %p185_p3 = scmp.lt.s32.totalorder (!%p162_p2), %s556_s16, 1  ;;  %v685_v0 = vmov (!%p162_p2), 0.0|0.0   ;;  %s686_s21 = smov (!%p162_p2), 11   ;;  %vm694_vm0 = vmmov (!%p162_p2), 0   ;;  %v695_v2 = vmov (!%p162_p2), 0.0   ;;  %vm199_vm1 = vcmask (!%p162_p2), 1047640  }
   0x6   : > { %165 = sbr.rel (%p162_p2) target bundleno = 1077 (0x435), region = 36  ;;  %630 = vmatprep.subr.bf16.mxu0 (!%p162_p2), %v685_v0  ;;  %642 = vmatprep.subr.bf16.mxu1 (!%p162_p2), %v685_v0  ;;  %s687_s22 = smov (!%p162_p2), 9   ;;  %vm213_vm2 = vcmask (!%p162_p2), 1047624   ;;  %vm201_vm3 = vcmask (!%p162_p2), 89088   ;;  %vm215_vm4 = vcmask (!%p162_p2), 72704   ;;  %vm206_vm5 = vcmask (!%p162_p2), 1047632  }
   0x7   : > { %s688_s23 = smov (!%p162_p2), 10   ;;  %s689_s24 = smov (!%p162_p2), 1   ;;  %606 = vmatprep.mubr.msk.f32.mxu0 (!%p162_p2), %vm694_vm0, %v695_v2  ;;  %627 = vmatprep.mubr.msk.f32.mxu1 (!%p162_p2), %vm694_vm0, %v695_v2  ;;  %vm220_vm6 = vcmask (!%p162_p2), 1047560   ;;  %vm208_vm7 = vcmask (!%p162_p2), 80896   ;;  %vm222_vm8 = vcmask (!%p162_p2), 7168   ;;  %vm228_vm9 = vcmask (!%p162_p2), 1039360  }
   0x8   : > { %s690_s25 = smov (!%p162_p2), 127   ;;  %s691_s26 = smov (!%p162_p2), 119   ;;  %vm235_vm10 = vcmask (!%p162_p2), 973824   ;;  %vm230_vm11 = vcmask (!%p162_p2), 1048568   ;;  %vm237_vm12 = vcmask (!%p162_p2), 1048504   ;;  %vm242_vm13 = vcmask (!%p162_p2), 965632  }
   0x9   : > { %s692_s27 = smov (!%p162_p2), 118   ;;  %s693_s28 = smov (!%p162_p2), 117   ;;  %vm249_vm14 = vcmask (!%p162_p2), 957440   ;;  %vm854_vm15 = vcmask (!%p162_p2), 1048496   ;;  %vm251_vm0 = vcmask (!%p162_p2), 1048488   ;;  %v253_v23 = vld [vmem:[%s851_s2] sm:$0xff] (!%p162_p2) }
   0xa   : > { %v795_v24 = vld [vmem:[%s850_s1] ss:$0 sm:$0xff] (!%p162_p2) }
   0xb   : > { %v402_v62 = vld [vmem:[%s852_s3] sm:$0xff] (!%p162_p2) }
   0xd   : > { %s857_s16 = smov (!%p185_p3, %s556_s16), 1 }
   0xe   : > { %s561_s17 = sshll.u32 %s857_s16, 3 }
   0xf   : > { %s188_s20 = scalar_lea.vmem %s849_s0, %s561_s17  ;;  %s192_s11 = scalar_lea.vmem %s853_s4, %s561_s17 }
  0x10   : > { %v739_v1 = vld [vmem:[%s188_s20] sm:$0xff] }
  0x11   : > { %196 = vrot.lane.b32.xlu0 %v739_v1, %s686_s21  ;;  %210 = vrot.lane.b32.xlu1 %v739_v1, %s687_s22 }
  0x15   : > { %203 = vrot.lane.b32.xlu0 %v739_v1, %s688_s23  ;;  %217 = vrot.lane.b32.xlu1 %v739_v1, %s689_s24 }
  0x19   : > { %225 = vrot.lane.b32.xlu0 %v739_v1, %s690_s25  ;;  %232 = vrot.lane.b32.xlu1 %v739_v1, %s691_s26 }
  0x1d   : > { %239 = vrot.lane.b32.xlu0 %v739_v1, %s692_s27  ;;  %246 = vrot.lane.b32.xlu1 %v739_v1, %s693_s28 }
  0x83   : > { %v197_v3 = vpop.permute.xlu0 %196  ;;  %v211_v4 = vpop.permute.xlu1 %210 }
  0x84   : > { %200 = vst.msk [vmem:[#allocation2] sm:$0xff] %vm199_vm1, %v197_v3 }
  0x85   : > { %214 = vst.msk [vmem:[#allocation2 + $0x10] sm:$0xff] %vm213_vm2, %v211_v4 }
  0x86   : > { %202 = vst.msk [vmem:[#allocation2] sm:$0xff] %vm201_vm3, %v695_v2 }
  0x87   : > { %216 = vst.msk [vmem:[#allocation2 + $0x10] sm:$0xff] %vm215_vm4, %v695_v2  ;;  %v204_v5 = vpop.permute.xlu0 %203  ;;  %v218_v6 = vpop.permute.xlu1 %217 }
  0x88   : > { %207 = vst.msk [vmem:[#allocation2 + $0x8] sm:$0xff] %vm206_vm5, %v204_v5 }
  0x89   : > { %221 = vst.msk [vmem:[#allocation2 + $0x18] sm:$0xff] %vm220_vm6, %v218_v6 }
  0x8a   : > { %209 = vst.msk [vmem:[#allocation2 + $0x8] sm:$0xff] %vm208_vm7, %v695_v2 }
  0x8b   : > { %223 = vst.msk [vmem:[#allocation2 + $0x18] sm:$0xff] %vm222_vm8, %v695_v2  ;;  %v226_v7 = vpop.permute.xlu0 %225  ;;  %v233_v8 = vpop.permute.xlu1 %232 }
  0x8c   : > { %229 = vst.msk [vmem:[#allocation2 + $0x28] sm:$0xff] %vm228_vm9, %v226_v7 }
  0x8d   : > { %236 = vst.msk [vmem:[#allocation2 + $0x30] sm:$0xff] %vm235_vm10, %v233_v8  ;;  %v254_v9 = vld [vmem:[#allocation2] sm:$0xff] }
  0x8e   : > { %231 = vst.msk [vmem:[#allocation2 + $0x28] sm:$0xff] %vm230_vm11, %v695_v2  ;;  %v256_v13 = vld [vmem:[#allocation2 + $0x10] sm:$0xff] }
  0x8f   : > { %238 = vst.msk [vmem:[#allocation2 + $0x30] sm:$0xff] %vm237_vm12, %v695_v2  ;;  %v240_v10 = vpop.permute.xlu0 %239  ;;  %v247_v11 = vpop.permute.xlu1 %246 }
  0x90   : > { %243 = vst.msk [vmem:[#allocation2 + $0x38] sm:$0xff] %vm242_vm13, %v240_v10 }
  0x91   : > { %v255_v12 = vld [vmem:[#allocation2 + $0x8] sm:$0xff]  ;;  %250 = vst.msk [vmem:[#allocation2 + $0x40] sm:$0xff] %vm249_vm14, %v247_v11 }
  0x92   : > { %v257_v14 = vld [vmem:[#allocation2 + $0x18] sm:$0xff]  ;;  %v631_v15 = vpack.c.bf16 %v255_v12, %v254_v9  ;;  %245 = vst.msk [vmem:[#allocation2 + $0x38] sm:$0xff] %vm854_vm15, %v695_v2  ;;  %vm263_vm15 = vcmask 588800  }
  0x93   : > { %252 = vst.msk [vmem:[#allocation2 + $0x40] sm:$0xff] %vm251_vm0, %v695_v2  ;;  %v634_v16 = vpack.c.bf16 %v257_v14, %v256_v13 }
  0x94   : > { %632 = vmatpush3.bf16.msra.mxu0 %v631_v15 }
  0x95   : > { %633 = vmatprep.subr.bf16.mxu0 %v685_v0  ;;  %v259_v17 = vld [vmem:[#allocation2 + $0x28] sm:$0xff] }
  0x96   : > { %v637_v18 = vpack.c.bf16 %v259_v17, %v739_v1  ;;  %v260_v19 = vld [vmem:[#allocation2 + $0x30] sm:$0xff] }
  0x98   : > { %635 = vmatpush3.bf16.msra.mxu0 %v634_v16 }
  0x99   : > { %636 = vmatprep.subr.bf16.mxu0 %v685_v0  ;;  %v261_v20 = vld [vmem:[#allocation2 + $0x38] sm:$0xff] }
  0x9a   : > { %v640_v21 = vpack.c.bf16 %v261_v20, %v260_v19  ;;  %v262_v22 = vld [vmem:[#allocation2 + $0x40] sm:$0xff] }
  0x9c   : > { %638 = vmatpush3.bf16.msra.mxu0 %v637_v18 }
  0x9d   : > { %639 = vmatprep.subr.bf16.mxu0 %v685_v0 }
  0xa0   : > { %641 = vmatpush3.bf16.msra.mxu0 %v640_v21 }
  0xa1   : > { %604 = vmatprep.subr.mxu0 %v695_v2 }
  0xa4   : > { %605 = vmatpush3.msra.mxu0 %v262_v22 }
  0xa5   : > { %607 = vmatmul.mubr.msk.f32.vlgmr.msra.gmra.mrb[0].mxu0 %vm263_vm15, %v253_v23 }
 0x178   : > { %v333_v25 = vpop.f32.mrb[0].mxu0 }
 0x179   : > { %v608_v26 = vpop.f32.mrb[1].mxu0  ;;  %v343_v27 = vmul.f32 %v795_v24, %v333_v25 }
 0x17b   : > { %344 = vadd.xlane.f32.xlu0 %v343_v27  ;;  %v346_v28 = vmul.f32 %v343_v27, %v333_v25 }
 0x17d   : > { %347 = vadd.xlane.f32.xlu1 %v346_v28 }
 0x208   : > { %v345_v29 = vpop.xlane.xlu0 %344 }
 0x209   : > { %v349_v30 = vmul.f32 0.015625, %v345_v29 }
 0x20a   : > { %v348_v31 = vpop.xlane.xlu1 %347 }
 0x20b   : > { %v351_v32 = vmul.f32 %v349_v30, %v349_v30  ;;  %v350_v33 = vmul.f32 0.015625, %v348_v31  ;;  %v354_v37 = vsub.f32 %v333_v25, %v349_v30 }
 0x20d   : > { %v352_v34 = vsub.f32 %v350_v33, %v351_v32 }
 0x20f   : > { %v353_v35 = vmax.f32 %v352_v34, 0.0 }
 0x211   : > { %v355_v36 = vadd.f32 1e-05, %v353_v35 }
 0x213   : > { %673 = vrsqrt.f32 %v355_v36 }
 0x21d   : > { %v674_v38 = vpop.eup %673 }
 0x21e   : > { %v357_v39 = vmul.f32 %v674_v38, %v354_v37 }
 0x220   : > { %v358_v40 = vmax.f32 %v357_v39, 0.0 }
 0x222   : > { %v359_v41 = vmul.f32 %v795_v24, %v358_v40 }
 0x224   : > { %366 = vrot.lane.b32.xlu1 %v359_v41, %s688_s23  ;;  %361 = vrot.lane.b32.xlu0 %v359_v41, %s686_s21 }
 0x228   : > { %376 = vrot.lane.b32.xlu1 %v359_v41, %s689_s24  ;;  %371 = vrot.lane.b32.xlu0 %v359_v41, %s687_s22 }
 0x22c   : > { %387 = vrot.lane.b32.xlu1 %v359_v41, %s691_s26  ;;  %382 = vrot.lane.b32.xlu0 %v359_v41, %s690_s25 }
 0x230   : > { %397 = vrot.lane.b32.xlu1 %v359_v41, %s693_s28  ;;  %392 = vrot.lane.b32.xlu0 %v359_v41, %s692_s27 }
 0x296   : > { %v367_v42 = vpop.permute.xlu1 %366  ;;  %v362_v43 = vpop.permute.xlu0 %361 }
 0x297   : > { %369 = vst.msk [vmem:[#allocation3 + $0x8] sm:$0xff] %vm206_vm5, %v367_v42 }
 0x298   : > { %364 = vst.msk [vmem:[#allocation3] sm:$0xff] %vm199_vm1, %v362_v43  ;;  %vm855_vm1 = vcmask 1048496  }
 0x299   : > { %370 = vst.msk [vmem:[#allocation3 + $0x8] sm:$0xff] %vm208_vm7, %v695_v2 }
 0x29a   : > { %365 = vst.msk [vmem:[#allocation3] sm:$0xff] %vm201_vm3, %v695_v2  ;;  %v377_v44 = vpop.permute.xlu1 %376  ;;  %v372_v45 = vpop.permute.xlu0 %371 }
 0x29b   : > { %379 = vst.msk [vmem:[#allocation3 + $0x18] sm:$0xff] %vm220_vm6, %v377_v44 }
 0x29c   : > { %374 = vst.msk [vmem:[#allocation3 + $0x10] sm:$0xff] %vm213_vm2, %v372_v45 }
 0x29d   : > { %380 = vst.msk [vmem:[#allocation3 + $0x18] sm:$0xff] %vm222_vm8, %v695_v2 }
 0x29e   : > { %375 = vst.msk [vmem:[#allocation3 + $0x10] sm:$0xff] %vm215_vm4, %v695_v2  ;;  %v388_v46 = vpop.permute.xlu1 %387  ;;  %v383_v47 = vpop.permute.xlu0 %382 }
 0x29f   : > { %390 = vst.msk [vmem:[#allocation3 + $0x30] sm:$0xff] %vm235_vm10, %v388_v46 }
 0x2a0   : > { %385 = vst.msk [vmem:[#allocation3 + $0x28] sm:$0xff] %vm228_vm9, %v383_v47  ;;  %v404_v49 = vld [vmem:[#allocation3 + $0x8] sm:$0xff] }
 0x2a1   : > { %v403_v48 = vld [vmem:[#allocation3] sm:$0xff]  ;;  %391 = vst.msk [vmem:[#allocation3 + $0x30] sm:$0xff] %vm237_vm12, %v695_v2 }
 0x2a2   : > { %386 = vst.msk [vmem:[#allocation3 + $0x28] sm:$0xff] %vm230_vm11, %v695_v2  ;;  %v643_v50 = vpack.c.bf16 %v404_v49, %v403_v48  ;;  %v398_v51 = vpop.permute.xlu1 %397  ;;  %v393_v52 = vpop.permute.xlu0 %392 }
 0x2a3   : > { %400 = vst.msk [vmem:[#allocation3 + $0x40] sm:$0xff] %vm249_vm14, %v398_v51 }
 0x2a4   : > { %644 = vmatpush3.bf16.msra.mxu1 %v643_v50  ;;  %395 = vst.msk [vmem:[#allocation3 + $0x38] sm:$0xff] %vm242_vm13, %v393_v52  ;;  %v406_v54 = vld [vmem:[#allocation3 + $0x18] sm:$0xff] }
 0x2a5   : > { %645 = vmatprep.subr.bf16.mxu1 %v685_v0  ;;  %v405_v53 = vld [vmem:[#allocation3 + $0x10] sm:$0xff]  ;;  %401 = vst.msk [vmem:[#allocation3 + $0x40] sm:$0xff] %vm251_vm0, %v695_v2 }
 0x2a6   : > { %396 = vst.msk [vmem:[#allocation3 + $0x38] sm:$0xff] %vm855_vm1, %v695_v2  ;;  %v646_v55 = vpack.c.bf16 %v406_v54, %v405_v53 }
 0x2a8   : > { %647 = vmatpush3.bf16.msra.mxu1 %v646_v55  ;;  %v409_v58 = vld [vmem:[#allocation3 + $0x30] sm:$0xff] }
 0x2a9   : > { %648 = vmatprep.subr.bf16.mxu1 %v685_v0  ;;  %v408_v56 = vld [vmem:[#allocation3 + $0x28] sm:$0xff] }
 0x2aa   : > { %v649_v57 = vpack.c.bf16 %v408_v56, %v359_v41 }
 0x2ac   : > { %650 = vmatpush3.bf16.msra.mxu1 %v649_v57  ;;  %v411_v61 = vld [vmem:[#allocation3 + $0x40] sm:$0xff] }
 0x2ad   : > { %651 = vmatprep.subr.bf16.mxu1 %v685_v0  ;;  %v410_v59 = vld [vmem:[#allocation3 + $0x38] sm:$0xff] }
 0x2ae   : > { %v652_v60 = vpack.c.bf16 %v410_v59, %v409_v58 }
 0x2b0   : > { %653 = vmatpush3.bf16.msra.mxu1 %v652_v60 }
 0x2b1   : > { %625 = vmatprep.subr.mxu1 %v695_v2 }
 0x2b4   : > { %626 = vmatpush3.msra.mxu1 %v411_v61 }
 0x2b5   : > { %628 = vmatmul.mubr.msk.f32.vlgmr.msra.gmra.mrb[0].mxu1 %vm263_vm15, %v402_v62 }
 0x388   : > { %v481_v63 = vpop.f32.mrb[0].mxu1 }
 0x389   : > { %v629_v1 = vpop.f32.mrb[1].mxu1  ;;  %v485_v3 = vmul.f32 %v795_v24, %v481_v63 }
 0x38b   : > { %486 = vadd.xlane.f32.xlu0 %v485_v3  ;;  %v488_v0 = vmul.f32 %v485_v3, %v481_v63 }
 0x38d   : > { %489 = vadd.xlane.f32.xlu1 %v488_v0 }
 0x418   : > { %v487_v4 = vpop.xlane.xlu0 %486 }
 0x419   : > { %v491_v5 = vmul.f32 0.015625, %v487_v4 }
 0x41a   : > { %v490_v6 = vpop.xlane.xlu1 %489 }
 0x41b   : > { %v493_v2 = vmul.f32 %v491_v5, %v491_v5  ;;  %v492_v7 = vmul.f32 0.015625, %v490_v6  ;;  %v496_v11 = vsub.f32 %v481_v63, %v491_v5 }
 0x41d   : > { %v494_v8 = vsub.f32 %v492_v7, %v493_v2 }
 0x41f   : > { %v495_v9 = vmax.f32 %v494_v8, 0.0 }
 0x421   : > { %v497_v10 = vadd.f32 1e-05, %v495_v9 }
 0x423   : > { %675 = vrsqrt.f32 %v497_v10 }
 0x42d   : > { %v676_v12 = vpop.eup %675 }
 0x42e   : > { %v499_v13 = vmul.f32 %v676_v12, %v496_v11 }
 0x430   : > { %v500_v14 = vmax.f32 %v499_v13, 0.0 }
 0x432   : > { %v501_v15 = vmul.f32 %v795_v24, %v500_v14 }
 0x434   : > { %502 = vst [vmem:[%s192_s11] sm:$0xff] %v501_v15 }
 0x435 PF: > { %s14_s15 = sadd.s32 1, %s683_s15  }
 0x436   : > { %p11_p4 = scmp.ge.s32.totalorder %s14_s15, 4  }
 0x438   :  { %13 = sbr.rel (!%p11_p4) target bundleno = 1 (0x1), region = 66 }

</bundles_post_ra>
